<compile_context>
chip_gen: v6e
topology: v6e:2x2x1
jax: 0.10.0
libtpu: 0.0.40
codegen_flags: <defaults>
</compile_context>

<pallas_src>
import functools

import jax
import jax.numpy as jnp
from jax.experimental import pallas as pl
from jax.experimental.pallas import tpu as pltpu

EPS = 1e-7  # matches the PyTorch module's torch.log(true_probs + 1e-07)

_LANE = 128
_MiB = 1024 * 1024


def _focal_loss_kernel(x_ref, t_ref, o_ref, *, alpha, gamma):
    """Per-row focal loss for one (tile_n, C) block of logits."""
    # Stream native dtype from HBM; do math in f32 (v5e has no bf16 VPU/EUP).
    x = x_ref[...].astype(jnp.float32)            # (tile_n, C)
    t = t_ref[...]                                # (tile_n, 1) int32

    # Row-wise stable softmax statistics; full probs never materialized.
    m = jnp.max(x, axis=1, keepdims=True)         # (tile_n, 1)
    e = jnp.exp(x - m)                            # (tile_n, C)
    denom = jnp.sum(e, axis=1, keepdims=True)     # (tile_n, 1)

    # One-hot gather of the true-class *exponential* (reuses `e`; avoids a
    # second exp and a log(denom) on column vectors).
    col = jax.lax.broadcasted_iota(jnp.int32, x.shape, 1)
    e_true = jnp.sum(jnp.where(col == t, e, 0.0), axis=1, keepdims=True)
    # NOTE: out-of-range targets (t < 0 or t >= C) select nothing -> p_true=0,
    # giving a finite -alpha*log(eps) term; torch.gather would error instead.
    p_true = e_true / denom                       # exact divide (tolerance)

    # Same epsilon semantics as the PyTorch module: log(p + 1e-7).
    log_p = jnp.log(p_true + EPS)
    one_minus = 1.0 - p_true
    if gamma == 2.0:
        focal_w = one_minus * one_minus           # single VPU multiply
    elif gamma == 1.0:
        focal_w = one_minus
    elif gamma == 0.0:
        focal_w = jnp.ones_like(one_minus)
    else:
        # p_true can round to just above 1.0 -> clamp so power() never NaNs.
        focal_w = jnp.power(jnp.maximum(one_minus, 0.0), gamma)

    o_ref[...] = (-alpha) * focal_w * log_p       # (tile_n, 1) per-row loss


def _row_vmem_bytes(c, dtype_bytes):
    """VMEM bytes one row of the pipelined blocks occupies (lane-padded)."""
    c_pad = ((c + _LANE - 1) // _LANE) * _LANE
    # logits row + lane-padded targets row + lane-padded per-row-loss row
    return c_pad * dtype_bytes + _LANE * 4 + _LANE * 4


def _choose_tile_n(n, c, dtype_bytes, *,
                   target_block_bytes=2 * _MiB,
                   vmem_budget_bytes=32 * _MiB):
    """Pick tile_n from a byte budget instead of a fixed row count."""
    c_pad = ((c + _LANE - 1) // _LANE) * _LANE
    row_bytes = _row_vmem_bytes(c, dtype_bytes)
    tile_from_vmem = vmem_budget_bytes // (2 * row_bytes)      # double-buffered
    tile_from_block = max(target_block_bytes // (c_pad * dtype_bytes), 1)
    tile_n = int(min(tile_from_vmem, tile_from_block, 8192))
    tile_n = max((tile_n // 16) * 16, 16)   # multiple of 16 covers bf16 packing
    if n <= tile_n:
        return n                            # single full-array block (8-div exempt)
    return tile_n


def focal_loss(inputs, targets, *, alpha=1.0, gamma=2.0, reduction="mean",
               tile_n=None):
    """inputs: (N, C) float logits; targets: (N,) int labels.

    reduction: 'mean' | 'sum' -> scalar; 'none' -> (N,) per-row losses.
    """
    n, c = inputs.shape
    t2d = targets.astype(jnp.int32).reshape(n, 1)
    dtype_bytes = jnp.dtype(inputs.dtype).itemsize

    if tile_n is None:
        tile_n = _choose_tile_n(n, c, dtype_bytes)
    else:
        tile_n = int(min(tile_n, n))
        if tile_n < n and tile_n % 8 != 0:
            raise ValueError("tile_n must be a multiple of 8 when gridded")

    n_blocks = pl.cdiv(n, tile_n)
    padded_n = n_blocks * tile_n            # output padded so all out blocks are full

    # VMEM limit derived from the actual double-buffered block footprint,
    # capped well under v7x's 64 MiB physical VMEM.
    row_bytes = _row_vmem_bytes(c, dtype_bytes)
    vmem_need = 2 * tile_n * row_bytes
    vmem_limit = int(min(48 * _MiB, max(8 * _MiB, vmem_need + 4 * _MiB)))

    cost = pl.CostEstimate(
        flops=int(6 * n * c),
        transcendentals=int(n * c + 2 * n),
        bytes_accessed=int(n * c * dtype_bytes + n * 4 + padded_n * 4),
    )

    kernel = functools.partial(_focal_loss_kernel,
                               alpha=float(alpha), gamma=float(gamma))

    out = pl.pallas_call(
        kernel,
        out_shape=jax.ShapeDtypeStruct((padded_n, 1), jnp.float32),
        grid_spec=pltpu.PrefetchScalarGridSpec(
            num_scalar_prefetch=0,
            grid=(n_blocks,),
            in_specs=[
                pl.BlockSpec((tile_n, c), lambda i: (i, 0)),   # logits tile
                pl.BlockSpec((tile_n, 1), lambda i: (i, 0)),   # targets tile
            ],
            out_specs=pl.BlockSpec((tile_n, 1), lambda i: (i, 0)),  # per-row losses
        ),
        compiler_params=pltpu.CompilerParams(
            dimension_semantics=("parallel",),   # independent blocks -> both v7x TCs
            vmem_limit_bytes=vmem_limit,
        ),
        cost_estimate=cost,
    )(inputs, t2d)

    per_row = out[:n, 0]                    # padded ragged rows excluded statically
    if reduction == "mean":
        return jnp.sum(per_row) / jnp.float32(n)
    elif reduction == "sum":
        return jnp.sum(per_row)
    elif reduction == "none":
        return per_row
    else:
        raise ValueError("reduction must be 'mean', 'sum' or 'none'")


def _focal_loss_ref(inputs, targets, alpha=1.0, gamma=2.0, reduction="mean"):
    probs = jax.nn.softmax(inputs.astype(jnp.float32), axis=1)
    tp = jnp.take_along_axis(probs, targets[:, None], axis=1)[:, 0]
    logp = jnp.log(tp + EPS)
    fw = (1.0 - tp) ** gamma
    loss = -alpha * fw * logp
    if reduction == "mean":
        return jnp.mean(loss)
    elif reduction == "sum":
        return jnp.sum(loss)
    return loss


if __name__ == "__main__":
    key = jax.random.PRNGKey(0)
    k1, k2, k3, k4 = jax.random.split(key, 4)

    # Case 1: small single-tile (N, C) = (8, 32), mean reduction, gamma=2.
    N1, C1 = 8, 32
    logits1 = jax.random.normal(k1, (N1, C1), dtype=jnp.float32)
    labels1 = jax.random.randint(k2, (N1,), 0, C1, dtype=jnp.int32)
    out1 = jax.block_until_ready(focal_loss(logits1, labels1))
    ref1 = _focal_loss_ref(logits1, labels1)
    assert jnp.allclose(out1, ref1, atol=1e-5, rtol=1e-5), (out1, ref1)

    # Case 2: gridded + ragged last tile (N=40, forced 16-row tiles), mean.
    N2, C2 = 40, 32
    logits2 = jax.random.normal(k3, (N2, C2), dtype=jnp.float32)
    labels2 = jax.random.randint(k4, (N2,), 0, C2, dtype=jnp.int32)
    out2 = jax.block_until_ready(focal_loss(logits2, labels2, tile_n=16))
    ref2 = _focal_loss_ref(logits2, labels2)
    assert jnp.allclose(out2, ref2, atol=1e-5, rtol=1e-5), (out2, ref2)

    # Case 3: generic (non-integer) gamma + 'sum' reduction, same gridded data.
    out3 = jax.block_until_ready(
        focal_loss(logits2, labels2, alpha=0.5, gamma=1.5, reduction="sum",
                   tile_n=16))
    ref3 = _focal_loss_ref(logits2, labels2, alpha=0.5, gamma=1.5,
                           reduction="sum")
    assert jnp.allclose(out3, ref3, atol=1e-4, rtol=1e-5), (out3, ref3)

    print("KERNEL_OK")
</pallas_src>

<mosaic_0001>
module attributes {stable_mosaic.version = 11 : i64} {
  func.func @_focal_loss_kernel(%arg0: i32, %arg1: memref<8x32xf32, #tpu.memory_space<vmem>>, %arg2: memref<8x1xi32, #tpu.memory_space<vmem>>, %arg3: memref<8x1xf32, #tpu.memory_space<vmem>>) attributes {dimension_semantics = [#tpu.dimension_semantics<parallel>], iteration_bounds = array<i64: 1>, scalar_prefetch = 0 : i64, scratch_operands = 0 : i64, tpu.core_type = #tpu.core_type<tc>, window_params = [{transform_indices = @transform_0, window_bounds = array<i64: 8, 32>}, {transform_indices = @transform_1, window_bounds = array<i64: 8, 1>}, {transform_indices = @transform_2, window_bounds = array<i64: 8, 1>}]} {
    %c0 = arith.constant 0 : index
    %c0_0 = arith.constant 0 : index
    %0 = vector.load %arg1[%c0, %c0_0] : memref<8x32xf32, #tpu.memory_space<vmem>>, vector<8x32xf32>
    %c0_1 = arith.constant 0 : index
    %c0_2 = arith.constant 0 : index
    %1 = vector.load %arg2[%c0_1, %c0_2] : memref<8x1xi32, #tpu.memory_space<vmem>>, vector<8x1xi32>
    %cst = arith.constant dense<0xFF800000> : vector<8xf32>
    %2 = vector.multi_reduction <maximumf>, %0, %cst [1] : vector<8x32xf32> to vector<8xf32>
    %3 = vector.shape_cast %2 : vector<8xf32> to vector<8x1xf32>
    %4 = vector.broadcast %3 : vector<8x1xf32> to vector<8x32xf32>
    %5 = arith.subf %0, %4 : vector<8x32xf32>
    %6 = math.exp %5 : vector<8x32xf32>
    %cst_3 = arith.constant dense<0.000000e+00> : vector<8xf32>
    %7 = vector.multi_reduction <add>, %6, %cst_3 [1] : vector<8x32xf32> to vector<8xf32>
    %8 = vector.shape_cast %7 : vector<8xf32> to vector<8x1xf32>
    %9 = tpu.iota {dimensions = array<i32: 1>} : vector<8x32xi32>
    %10 = vector.broadcast %1 : vector<8x1xi32> to vector<8x32xi32>
    %11 = arith.cmpi eq, %9, %10 : vector<8x32xi32>
    %cst_4 = arith.constant 0.000000e+00 : f32
    %12 = vector.broadcast %cst_4 : f32 to vector<8x32xf32>
    %13 = arith.select %11, %6, %12 : vector<8x32xi1>, vector<8x32xf32>
    %cst_5 = arith.constant dense<0.000000e+00> : vector<8xf32>
    %14 = vector.multi_reduction <add>, %13, %cst_5 [1] : vector<8x32xf32> to vector<8xf32>
    %15 = vector.shape_cast %14 : vector<8xf32> to vector<8x1xf32>
    %16 = arith.divf %15, %8 : vector<8x1xf32>
    %cst_6 = arith.constant 1.000000e-07 : f32
    %17 = vector.broadcast %cst_6 : f32 to vector<8x1xf32>
    %18 = arith.addf %16, %17 : vector<8x1xf32>
    %19 = math.log %18 : vector<8x1xf32>
    %cst_7 = arith.constant 1.000000e+00 : f32
    %20 = vector.broadcast %cst_7 : f32 to vector<8x1xf32>
    %21 = arith.subf %20, %16 : vector<8x1xf32>
    %22 = arith.mulf %21, %21 : vector<8x1xf32>
    %cst_8 = arith.constant -1.000000e+00 : f32
    %23 = vector.broadcast %cst_8 : f32 to vector<8x1xf32>
    %24 = arith.mulf %23, %22 : vector<8x1xf32>
    %25 = arith.mulf %24, %19 : vector<8x1xf32>
    %c0_9 = arith.constant 0 : index
    %c0_10 = arith.constant 0 : index
    %26 = vector.load %arg3[%c0_9, %c0_10] : memref<8x1xf32, #tpu.memory_space<vmem>>, vector<8x1xf32>
    tpu.vector_store %arg3[%c0_9, %c0_10], %25 {strides = array<i32>} : memref<8x1xf32, #tpu.memory_space<vmem>>, vector<8x1xf32>,
    return
  }
  func.func @transform_0(%arg0: i32) -> (i32, i32) {
    %c0_i32 = arith.constant 0 : i32
    %c0_i32_0 = arith.constant 0 : i32
    return %arg0, %c0_i32 : i32, i32
  }
  func.func @transform_1(%arg0: i32) -> (i32, i32) {
    %c0_i32 = arith.constant 0 : i32
    %c0_i32_0 = arith.constant 0 : i32
    return %arg0, %c0_i32 : i32, i32
  }
  func.func @transform_2(%arg0: i32) -> (i32, i32) {
    %c0_i32 = arith.constant 0 : i32
    %c0_i32_0 = arith.constant 0 : i32
    return %arg0, %c0_i32 : i32, i32
  }
}

</mosaic_0001>

<bundles_post_ra>
// kernel: tpu_custom_call.1
= control target key start
LH: loop header
LB: loop body
LE: loop exit
PB: predicated region body
PF: predicated region fallthrough
CT: control target
= control target key end

     0   :  { %vm13_vm0 = vcmask 261120   ;;  %v56_v1 = vmov 0   ;;  %v23_v7 = vlaneseq  ;;  %vm42_vm2 = vcmask 7168   ;;  %s84_s0 = inlined_call_operand.vmem [shape: f32[8,32], index: 0, kind: input, shape index: {}]   ;;  %s85_s1 = inlined_call_operand.vmem [shape: s32[8,1], index: 1, kind: input, shape index: {}]   ;;  %s86_s2 = inlined_call_operand.vmem [shape: f32[8,1], index: 2, kind: output, shape index: {}]  }
   0x1   :  { %v11_v0 = vld [vmem:[%s84_s0] sm:$0xff]  ;;  %49 = vset.pattern.permute.xlu0 %v56_v1 }
   0x2   :  { %v14_v2 = vsel %vm13_vm0, %v11_v0, -inf  ;;  %v12_v3 = vld [vmem:[%s85_s1] sm:$0xff]  ;;  %v24_v8 = vand.u32 127, %v23_v7 }
   0x3   :  { %15 = vmax.xlane.f32.xlu0 %v14_v2 }
  0x19   :  { %26 = vperm.xlu0 %49, %v12_v3  }
  0x8c   :  { %v16_v4 = vpop.xlane.xlu0 %15 }
  0x8d   :  { %v17_v5 = vsub.f32 %v11_v0, %v16_v4 }
  0x8f   :  { %v18_v6 = vmul.f32 1.442695, %v17_v5 }
  0x91   :  { %50 = vpow2.f32 %v18_v6 }
  0x94   :  { %v27_v9 = vpop.permute.xlu0 %26 }
  0x95   :  { %vm28_vm1 = vcmp.eq.s32.totalorder %v24_v8, %v27_v9 }
  0x9e   :  { %v51_v10 = vpop.eup %50 }
  0x9f   :  { %v20_v11 = vsel %vm13_vm0, %v51_v10, 0.0  ;;  %v29_v12 = vsel %vm28_vm1, %v51_v10, 0.0 }
  0xa0   :  { %21 = vadd.xlane.f32.xlu1 %v20_v11  ;;  %v30_v13 = vsel %vm13_vm0, %v29_v12, 0.0 }
  0xa4   :  { %31 = vadd.xlane.f32.xlu1 %v30_v13 }
 0x129   :  { %v22_v14 = vpop.xlane.xlu1 %21 }
 0x12a   :  { %52 = vrcp.f32 %v22_v14 }
 0x12d   :  { %v32_v16 = vpop.xlane.xlu1 %31 }
 0x137   :  { %v53_v15 = vpop.eup %52 }
 0x138   :  { %v34_v17 = vmul.f32 %v53_v15, %v32_v16 }
 0x13a   :  { %v35_v18 = vadd.f32 1e-07, %v34_v17  ;;  %v38_v19 = vsub.f32 1.0, %v34_v17 }
 0x13c   :  { %54 = vlog2.f32 %v35_v18  ;;  %v39_v20 = vmul.f32 %v38_v19, %v38_v19 }
 0x13e   :  { %v40_v23 = vmul.f32 -1.0, %v39_v20 }
 0x149   :  { %v55_v21 = vpop.eup %54 }
 0x14a   :  { %v37_v22 = vmul.f32 0.6931472, %v55_v21 }
 0x14c   :  { %v41_v24 = vmul.f32 %v40_v23, %v37_v22 }
 0x14e   :  { %43 = vst.msk [vmem:[%s86_s2] sm:$0xff] %vm42_vm2, %v41_v24 }

</bundles_post_ra>
